<compile_context>
chip_gen: v7x
topology: tpu7x:2x2x1
jax: 0.10.0
libtpu: 0.0.40
codegen_flags: <defaults>
</compile_context>

<pallas_src>
import math

import jax
import jax.numpy as jnp
from jax.experimental import pallas as pl
from jax.experimental.pallas import tpu as pltpu


def _round_up(x: int, m: int) -> int:
    return (x + m - 1) // m * m


# --------------------------------------------------------------------------
# Kernel: one (TS, I) sequence slab of one (ensemble, batch) pair per step.
# --------------------------------------------------------------------------
def batch_linear_kernel(x_ref, r_ref, s_ref, w_ref, o_ref):
    # x_ref: (TS, I) f32   r_ref: (1, I) f32   s_ref: (1, O) f32
    # w_ref: (I, O) bf16   o_ref: (TS, O)
    # Single quantization: r-scale in f32 on the VPU, one cast to the MXU dtype.
    xr = (x_ref[...] * r_ref[...]).astype(w_ref.dtype)                   # (TS, I)
    acc = jnp.dot(xr, w_ref[...], preferred_element_type=jnp.float32)    # (TS, O) f32
    o_ref[...] = (acc * s_ref[...]).astype(o_ref.dtype)


# --------------------------------------------------------------------------
# Wrapper
# --------------------------------------------------------------------------
def batch_linear(x, r, w, s, bias=None, *, ts: int = 512,
                 mxu_dtype=jnp.bfloat16, out_dtype=None):
    """x: (B, E, *rest, I); r: (E, I); w: (I, O); s: (E, O); bias: (E, O) or None.

    Returns (B, E, *rest, O).
    """
    B, E = x.shape[0], x.shape[1]
    rest = x.shape[2:-1]
    I = x.shape[-1]
    O = w.shape[1]
    S = 1
    for d in rest:
        S *= d
    if out_dtype is None:
        out_dtype = x.dtype

    # Fold "..." into a single S axis — a contiguous reshape, no data movement.
    x4 = x.reshape(B, E, S, I)

    # The torch bias path multiplies the output per (E, O): fold it into s.
    s_eff = s.astype(jnp.float32)
    if bias is not None:
        s_eff = s_eff * bias.astype(jnp.float32)

    # ---- choose the sequence tile -----------------------------------------
    Sp = S
    if S <= ts:
        ts_eff = max(S, 1)                      # full extent: always legal
    else:
        cap = max(16, (ts // 16) * 16)
        ts_eff = None
        for cand in range(cap, 15, -16):        # largest mult. of 16 dividing S
            if S % cand == 0:
                ts_eff = cand
                break
        if ts_eff is None:
            # Rare fallback: pad S (one pad pass; zero rows -> zero outputs).
            ts_eff = cap
            Sp = _round_up(S, ts_eff)
            x4 = jnp.pad(x4, ((0, 0), (0, 0), (0, Sp - S), (0, 0)))
    grid_s = Sp // ts_eff

    # MXU-dtype shared weight; f32 scale rows reshaped to (E, 1, *) so the
    # block's last-two dims equal the full dims (layout-legal, free reshape).
    w_q = w.astype(mxu_dtype)
    r3 = r.astype(jnp.float32).reshape(E, 1, I)
    s3 = s_eff.reshape(E, 1, O)

    grid = (E, B, grid_s)

    in_specs = [
        pl.BlockSpec((pl.Squeezed(), pl.Squeezed(), ts_eff, I),
                     lambda e, b, si: (b, e, si, 0)),          # x slab (native layout)
        pl.BlockSpec((pl.Squeezed(), 1, I),
                     lambda e, b, si: (e, 0, 0)),              # r row (per ensemble)
        pl.BlockSpec((pl.Squeezed(), 1, O),
                     lambda e, b, si: (e, 0, 0)),              # s row (per ensemble)
        pl.BlockSpec((I, O), lambda e, b, si: (0, 0)),         # shared weight, resident
        # TODO(synk): v7x — pipeline_mode=pl.Buffered(1) on the W spec above.
    ]
    out_spec = pl.BlockSpec((pl.Squeezed(), pl.Squeezed(), ts_eff, O),
                            lambda e, b, si: (b, e, si, 0))

    # VMEM budget: double-buffered x/out blocks + r/s rows + resident W.
    x_item = jnp.dtype(x.dtype).itemsize
    out_item = jnp.dtype(out_dtype).itemsize
    w_item = jnp.dtype(mxu_dtype).itemsize
    vmem_est = (2 * ts_eff * I * x_item
                + 2 * ts_eff * O * out_item
                + 2 * (I + O) * 4
                + 2 * I * O * w_item)
    vmem_limit = int(max(32 * 1024 * 1024, vmem_est * 1.3))

    cost = pl.CostEstimate(
        flops=2 * E * B * Sp * I * O + 2 * E * B * Sp * (I + O),
        transcendentals=0,
        bytes_accessed=(B * E * Sp * I * x_item        # x (read once, f32)
                        + I * O * w_item               # W
                        + E * (I + O) * 4              # r, s
                        + B * E * Sp * O * out_item),  # out
    )

    out = pl.pallas_call(
        batch_linear_kernel,
        out_shape=jax.ShapeDtypeStruct((B, E, Sp, O), out_dtype),
        grid_spec=pltpu.PrefetchScalarGridSpec(
            num_scalar_prefetch=0,
            grid=grid,
            in_specs=in_specs,
            out_specs=out_spec,
        ),
        compiler_params=pltpu.CompilerParams(
            dimension_semantics=("parallel", "parallel", "parallel"),
            vmem_limit_bytes=vmem_limit,
        ),
        cost_estimate=cost,
    )(x4, r3, s3, w_q)

    if Sp != S:
        out = out[:, :, :S, :]
    return out.reshape((B, E) + rest + (O,))


# --------------------------------------------------------------------------
# Reference + init (mirrors BatchLinear.reset_parameters / forward)
# --------------------------------------------------------------------------
def init_params(key, ensemble_size, in_features, out_features, with_bias=False):
    """std = gain(relu)/sqrt(fan_in); W ~ N(0,std); r,s ~ N(1,std); bias ~ N(0,std)."""
    kw, kr, ks, kb = jax.random.split(key, 4)
    std = math.sqrt(2.0) / math.sqrt(in_features)
    w = std * jax.random.normal(kw, (in_features, out_features), jnp.float32)
    r = 1.0 + std * jax.random.normal(kr, (ensemble_size, in_features), jnp.float32)
    s = 1.0 + std * jax.random.normal(ks, (ensemble_size, out_features), jnp.float32)
    if with_bias:
        b = std * jax.random.normal(kb, (ensemble_size, out_features), jnp.float32)
        return w, r, s, b
    return w, r, s


def _bcast(v, nrest):
    # (E, F) -> (E, 1*nrest, F) for broadcasting against (B, E, *rest, F)
    return v.reshape(v.shape[:1] + (1,) * nrest + v.shape[1:])


def batch_linear_ref_f32(x, r, w, s, bias=None):
    """Exact f32 reference of BatchLinear.forward."""
    nrest = x.ndim - 3
    out = jnp.einsum('...i,io->...o', x * _bcast(r, nrest), w) * _bcast(s, nrest)
    if bias is not None:
        out = out * _bcast(bias, nrest)
    return out


def batch_linear_ref_bf16(x, r, w, s, bias=None):
    """Reference with the same single bf16 quantization the kernel applies."""
    nrest = x.ndim - 3
    xr = (x * _bcast(r, nrest)).astype(jnp.bfloat16).astype(jnp.float32)
    wq = w.astype(jnp.bfloat16).astype(jnp.float32)
    out = jnp.einsum('...i,io->...o', xr, wq) * _bcast(s, nrest)
    if bias is not None:
        out = out * _bcast(bias, nrest)
    return out


# --------------------------------------------------------------------------
# Self-test
# --------------------------------------------------------------------------
if __name__ == "__main__":
    key = jax.random.PRNGKey(0)
    I, O = 128, 256   # lane-dense feature dims

    # ---- test 1: multiple "..." dims, single full-S tile, f32 and bf16 outputs
    B, E, rest = 2, 2, (4, 8)
    k1, k2, key = jax.random.split(key, 3)
    x = jax.random.normal(k1, (B, E) + rest + (I,), jnp.float32)
    w, r, s = init_params(k2, E, I, O)

    out = jax.block_until_ready(batch_linear(x, r, w, s))
    assert out.shape == (B, E) + rest + (O,)
    ref_q = batch_linear_ref_bf16(x, r, w, s)
    ref_f = batch_linear_ref_f32(x, r, w, s)
    assert jnp.allclose(out, ref_q, atol=2e-3, rtol=2e-3), "t1: mismatch vs bf16 ref"
    assert jnp.allclose(out, ref_f, atol=5e-2, rtol=5e-2), "t1: mismatch vs f32 ref"

    out_b = jax.block_until_ready(batch_linear(x, r, w, s, out_dtype=jnp.bfloat16))
    assert out_b.dtype == jnp.bfloat16
    assert jnp.allclose(out_b.astype(jnp.float32), ref_f, atol=1e-1, rtol=1e-1), \
        "t1: mismatch (bf16 output)"

    # ---- test 2: bias path (folded into s) + odd S as a full-extent tile
    B2, E2, S2 = 2, 3, 100
    k3, k4, key = jax.random.split(key, 3)
    x2 = jax.random.normal(k3, (B2, E2, S2, I), jnp.float32)
    w2, r2, s2, b2 = init_params(k4, E2, I, O, with_bias=True)

    out2 = jax.block_until_ready(batch_linear(x2, r2, w2, s2, bias=b2))
    assert out2.shape == (B2, E2, S2, O)
    ref2_q = batch_linear_ref_bf16(x2, r2, w2, s2, bias=b2)
    ref2_f = batch_linear_ref_f32(x2, r2, w2, s2, bias=b2)
    assert jnp.allclose(out2, ref2_q, atol=2e-3, rtol=2e-3), "t2: mismatch vs bf16 ref"
    assert jnp.allclose(out2, ref2_f, atol=5e-2, rtol=5e-2), "t2: mismatch vs f32 ref"

    # ---- test 3: S larger than the tile -> multi-step S grid (TS=128, 4 tiles)
    B3, E3, S3 = 1, 2, 512
    k5, k6, key = jax.random.split(key, 3)
    x3 = jax.random.normal(k5, (B3, E3, S3, I), jnp.float32)
    w3, r3_, s3_ = init_params(k6, E3, I, O)

    out3 = jax.block_until_ready(batch_linear(x3, r3_, w3, s3_, ts=128))
    assert out3.shape == (B3, E3, S3, O)
    ref3_q = batch_linear_ref_bf16(x3, r3_, w3, s3_)
    assert jnp.allclose(out3, ref3_q, atol=2e-3, rtol=2e-3), "t3: mismatch vs bf16 ref"

    # ---- test 4: no "..." dims at all (x is (B, E, I))
    k7, k8, key = jax.random.split(key, 3)
    x4 = jax.random.normal(k7, (2, 2, I), jnp.float32)
    w4, r4, s4 = init_params(k8, 2, I, O)
    out4 = jax.block_until_ready(batch_linear(x4, r4, w4, s4))
    assert out4.shape == (2, 2, O)
    assert jnp.allclose(out4, batch_linear_ref_bf16(x4, r4, w4, s4),
                        atol=2e-3, rtol=2e-3), "t4: mismatch vs bf16 ref"

    print("KERNEL_OK")
</pallas_src>

<mosaic_0001>
module attributes {stable_mosaic.version = 11 : i64} {
  func.func @batch_linear_kernel(%arg0: i32, %arg1: i32, %arg2: i32, %arg3: memref<1x1x32x128xf32, #tpu.memory_space<vmem>>, %arg4: memref<1x1x128xf32, #tpu.memory_space<vmem>>, %arg5: memref<1x1x256xf32, #tpu.memory_space<vmem>>, %arg6: memref<128x256xbf16, #tpu.memory_space<vmem>>, %arg7: memref<1x1x32x256xf32, #tpu.memory_space<vmem>>) attributes {dimension_semantics = [#tpu.dimension_semantics<parallel>, #tpu.dimension_semantics<parallel>, #tpu.dimension_semantics<parallel>], iteration_bounds = array<i64: 2, 2, 1>, scalar_prefetch = 0 : i64, scratch_operands = 0 : i64, tpu.core_type = #tpu.core_type<tc>, window_params = [{transform_indices = @transform_0, window_bounds = array<i64: 1, 1, 32, 128>}, {transform_indices = @transform_1, window_bounds = array<i64: 1, 1, 128>}, {transform_indices = @transform_2, window_bounds = array<i64: 1, 1, 256>}, {pipeline_mode = #tpu.pipeline_mode<synchronous>, transform_indices = @transform_3, window_bounds = array<i64: 128, 256>}, {transform_indices = @transform_4, window_bounds = array<i64: 1, 1, 32, 256>}]} {
    %c0 = arith.constant 0 : index
    %c0_0 = arith.constant 0 : index
    %c0_1 = arith.constant 0 : index
    %c0_2 = arith.constant 0 : index
    %0 = vector.load %arg3[%c0, %c0_0, %c0_1, %c0_2] : memref<1x1x32x128xf32, #tpu.memory_space<vmem>>, vector<1x1x32x128xf32>
    %1 = vector.shape_cast %0 : vector<1x1x32x128xf32> to vector<32x128xf32>
    %c0_3 = arith.constant 0 : index
    %c0_4 = arith.constant 0 : index
    %c0_5 = arith.constant 0 : index
    %2 = vector.load %arg4[%c0_3, %c0_4, %c0_5] : memref<1x1x128xf32, #tpu.memory_space<vmem>>, vector<1x1x128xf32>
    %3 = vector.shape_cast %2 : vector<1x1x128xf32> to vector<1x128xf32>
    %4 = vector.broadcast %3 : vector<1x128xf32> to vector<32x128xf32>
    %5 = arith.mulf %1, %4 : vector<32x128xf32>
    %6 = arith.truncf %5 : vector<32x128xf32> to vector<32x128xbf16>
    %c0_6 = arith.constant 0 : index
    %c0_7 = arith.constant 0 : index
    %7 = vector.load %arg6[%c0_6, %c0_7] : memref<128x256xbf16, #tpu.memory_space<vmem>>, vector<128x256xbf16>
    %cst = arith.constant dense<0.000000e+00> : vector<32x256xf32>
    %8 = tpu.matmul %6, %7, %cst {dimension_numbers = #tpu.dot_dimension_numbers<[1], [0], [0], [1], [0, 0, 1, 1], [], []>} : vector<32x128xbf16>, vector<128x256xbf16>, vector<32x256xf32> -> vector<32x256xf32>
    %c0_8 = arith.constant 0 : index
    %c0_9 = arith.constant 0 : index
    %c0_10 = arith.constant 0 : index
    %9 = vector.load %arg5[%c0_8, %c0_9, %c0_10] : memref<1x1x256xf32, #tpu.memory_space<vmem>>, vector<1x1x256xf32>
    %10 = vector.shape_cast %9 : vector<1x1x256xf32> to vector<1x256xf32>
    %11 = vector.broadcast %10 : vector<1x256xf32> to vector<32x256xf32>
    %12 = arith.mulf %8, %11 : vector<32x256xf32>
    %c0_11 = arith.constant 0 : index
    %c0_12 = arith.constant 0 : index
    %c0_13 = arith.constant 0 : index
    %c0_14 = arith.constant 0 : index
    %13 = vector.load %arg7[%c0_11, %c0_12, %c0_13, %c0_14] : memref<1x1x32x256xf32, #tpu.memory_space<vmem>>, vector<1x1x32x256xf32>
    %14 = vector.shape_cast %13 : vector<1x1x32x256xf32> to vector<32x256xf32>
    %15 = vector.shape_cast %12 : vector<32x256xf32> to vector<1x1x32x256xf32>
    tpu.vector_store %arg7[%c0_11, %c0_12, %c0_13, %c0_14], %15 {strides = array<i32>} : memref<1x1x32x256xf32, #tpu.memory_space<vmem>>, vector<1x1x32x256xf32>,
    return
  }
  func.func @transform_0(%arg0: i32, %arg1: i32, %arg2: i32) -> (i32, i32, i32, i32) {
    %c0_i32 = arith.constant 0 : i32
    %c0_i32_0 = arith.constant 0 : i32
    return %arg1, %arg0, %arg2, %c0_i32 : i32, i32, i32, i32
  }
  func.func @transform_1(%arg0: i32, %arg1: i32, %arg2: i32) -> (i32, i32, i32) {
    %c0_i32 = arith.constant 0 : i32
    %c0_i32_0 = arith.constant 0 : i32
    %c0_i32_1 = arith.constant 0 : i32
    return %arg0, %c0_i32, %c0_i32_0 : i32, i32, i32
  }
  func.func @transform_2(%arg0: i32, %arg1: i32, %arg2: i32) -> (i32, i32, i32) {
    %c0_i32 = arith.constant 0 : i32
    %c0_i32_0 = arith.constant 0 : i32
    %c0_i32_1 = arith.constant 0 : i32
    return %arg0, %c0_i32, %c0_i32_0 : i32, i32, i32
  }
  func.func @transform_3(%arg0: i32, %arg1: i32, %arg2: i32) -> (i32, i32) {
    %c0_i32 = arith.constant 0 : i32
    %c0_i32_0 = arith.constant 0 : i32
    %c0_i32_1 = arith.constant 0 : i32
    return %c0_i32, %c0_i32_0 : i32, i32
  }
  func.func @transform_4(%arg0: i32, %arg1: i32, %arg2: i32) -> (i32, i32, i32, i32) {
    %c0_i32 = arith.constant 0 : i32
    %c0_i32_0 = arith.constant 0 : i32
    return %arg1, %arg0, %arg2, %c0_i32 : i32, i32, i32, i32
  }
}

</mosaic_0001>

<bundles_post_ra>
// kernel: tpu_custom_call.1
= control target key start
LH: loop header
LB: loop body
LE: loop exit
PB: predicated region body
PF: predicated region fallthrough
CT: control target
= control target key end

     0   :  { %s1271_s0 = inlined_call_operand.hbm [shape: f32[2,2,32,128], index: 0, kind: input, shape index: {}]   ;;  %s1272_s1 = inlined_call_operand.vmem [shape: f32[2,1,128], index: 1, kind: input, shape index: {}]   ;;  %s1273_s2 = inlined_call_operand.vmem [shape: f32[2,1,256], index: 2, kind: input, shape index: {}]   ;;  %s1274_s3 = inlined_call_operand.hbm [shape: bf16[128,256], index: 3, kind: input, shape index: {}]   ;;  %s1275_s4 = inlined_call_operand.hbm [shape: f32[2,2,32,256], index: 4, kind: output, shape index: {}]  }
   0x1   :  { %1287 = sst [smem:[#allocation15_spill]] %s1274_s3 }
   0x2   :  { %1288 = sst [smem:[#allocation16_spill]] %s1275_s4 }
   0x3   :  { %9 = vsyncpa [#allocation3], 0 }
   0x4   :  { %11 = vsyncpa [#allocation3 + $0x1], 0 }
   0x5   :  { %12 = vsyncpa [#allocation6], 0 }
   0x6   :  { %13 = vsyncpa [#allocation4], 0 }
   0x7   :  { %15 = vsyncpa [#allocation4 + $0x1], 0  ;;  %s1003_s15 = smov 0   ;;  %s1005_s16 = smov 0  }
   0x8   :  { %s1007_s17 = smov 0   ;;  %s1009_s18 = smov 0  }
   0x9   :  { %s1011_s19 = smov 0   ;;  %s1013_s20 = smov 0  }
   0xa   :  { %s1015_s21 = smov 0   ;;  %s1017_s22 = smov 0  }
   0xb LB: > { %1289 = sst [smem:[#allocation11_spill]] %s940_s15  ;;  %s637_s23 = sadd.s32 4294967295, %s968_s22   ;;  %s968_s22 = sphi %s1017_s22, %s21_s22   ;;  %s964_s21 = sphi %s1015_s21, %s1321_s21   ;;  %s960_s20 = sphi %s1013_s20, %s1320_s20   ;;  %s956_s19 = sphi %s1011_s19, %s1319_s19   ;;  %s952_s18 = sphi %s1009_s18, %s1318_s18   ;;  %s948_s17 = sphi %s1007_s17, %s1317_s17   ;;  %s944_s16 = sphi %s1005_s16, %s1316_s16   ;;  %s940_s15 = sphi %s1003_s15, %s1315_s15  }
   0xc   : > { %s638_s24 = sadd.s32 4294967294, %s968_s22   ;;  %p64_p0 = scmp.ne.s32.totalorder %s944_s16, %s940_s15 }
   0xd   : > { %p1047_p1 = scmp.eq.s32.totalorder %s637_s23, 0  ;;  %p1051_p2 = scmp.eq.s32.totalorder %s637_s23, 3 }
   0xe   : > { %p171_p3 = scmp.eq.s32.totalorder %s638_s24, 3  ;;  %p639_p5 = scmp.ge.s32.totalorder %s968_s22, 1 }
   0xf   : > { %s1290_s25 = scalar_select %p1047_p1, 1, 0 }
  0x10   : > { %s1291_s26 = scalar_select %p1051_p2, 1, 0 }
  0x11   : > { %p1057_p4 = por %p1047_p1, %p64_p0  ;;  %p1062_p6 = por %p171_p3, %p64_p0 }
  0x12   : > { %p178_p7 = scmp.lt.s32.totalorder %s968_s22, 5  ;;  %s970_s30 = smov [#allocation5]  }
  0x13   : > { %s1292_s27 = scalar_select %p1057_p4, 1, 0 }
  0x14   : > { %s1293_s28 = scalar_select %p1062_p6, 1, 0 }
  0x15   : > { %p1067_p8 = pnand %p639_p5, %p178_p7  ;;  %s190_s5 = sshll.u32 %s970_s30, 4  ;;  %s191_s5 = int_to_ptr.vmem [resolvable:$true] %s190_s5 }
  0x16   : > { %1294 = sst [smem:[#allocation12_spill]] %s1293_s28  ;;  %s1297_s3 = sld [smem:[#allocation15_spill]] }
  0x17   : > { %s1295_s29 = scalar_select %p1067_p8, 1, 0 }
  0x18   : > { %p698_p9 = pneg %p1067_p8 }
  0x1a   : > { %p1075_p10 = pnand %p698_p9, %p1047_p1 }
  0x1c   : > { %s808_s9 = scalar_lea.hbm %s1297_s3, 2048  ;;  %p810_p12 = pneg %p1075_p10 }
  0x1d   : > { %p809_p11 = scmp.ne.s32.totalorder %s1297_s3, %s808_s9  ;;  %p815_p3 = scmp.lt.u32.totalorder %s808_s9, %s1297_s3 }
  0x1f   : > { %p811_p13 = pnand %p810_p12, %p809_p11 }
  0x21   : > { %p812_p0 = pneg %p811_p13 }
  0x23   : > { %p817_p5 = pnand %p815_p3, %p812_p0 }
  0x25   : > { %820 = shalt.err (!%p817_p5)
}
  0x26   : > { %s821_s14 = scalar_lea.vmem %s191_s5, 2048  ;;  %p829_p1 = scmp.lt.s32.totalorder %s191_s5, %s191_s5 }
  0x27   : > { %p822_p7 = scmp.ne.s32.totalorder %s191_s5, %s821_s14  ;;  %p830_p4 = scmp.lt.s32.totalorder %s821_s14, %s821_s14 }
  0x29   : > { %p824_p9 = pnand %p822_p7, %p810_p12  ;;  %p831_p8 = por %p830_p4, %p829_p1 }
  0x2b   : > { %p825_p6 = pneg %p824_p9 }
  0x2d   : > { %p832_p2 = pnand %p831_p8, %p825_p6 }
  0x2f   : > { %835 = shalt.err (!%p832_p2)
}
  0x30   : > { %s1280_s23 = smov 128   ;;  %s1281_s24 = smov 8  }
  0x31   : > { %701 = dma.hbm_to_vmem [thread:$0]  (!%p1075_p10), %s1297_s3, 2048, %s191_s5, [#allocation6], %s1280_s23, %s1280_s23, %s1281_s24  }
  0x32   : > { %s36_s8 = sadd.s32 1, %s960_s20  ;;  %s40_s9 = sadd.s32 1, %s964_s21 }
  0x33   : > { %p38_p1 = scmp.ge.s32.totalorder %s36_s8, 2  ;;  %s51_s10 = sadd.s32 1, %s948_s17 }
  0x34   : > { %p58_p2 = scmp.ne.s32.totalorder %s948_s17, %s944_s16  ;;  %p59_p4 = scmp.eq.s32.totalorder %s968_s22, 0 }
  0x35   : > { %s1323_s8 = smov (%p38_p1, %s36_s8), 0  ;;  %s1325_s9 = smov (!%p38_p1, %s40_s9), %s964_s21 }
  0x36   : > { %1298 = sst [smem:[#allocation13_spill]] %s1323_s8  ;;  %s44_s6 = ssub.s32 %s960_s20, %s1323_s8 }
  0x37   : > { %p42_p6 = scmp.ge.s32.totalorder %s1325_s9, 2  ;;  %p1299_p8 = scmp.ne.s32.totalorder %s1291_s26, 0 }
  0x38   : > { %p1115_p10 = por %p59_p4, %p58_p2  ;;  %p711_p12 = scmp.lt.s32.totalorder %s968_s22, 4 }
  0x39   : > { %p1111_p11 = por %p1299_p8, %p58_p2  ;;  %s1327_s9 = smov (%p42_p6, %s1325_s9), 0 }
  0x3a   : > { %1302 = sst [smem:[#allocation14_spill]] %s1327_s9  ;;  %s204_s12 = sand.u32 1, %s948_s17  }
  0x3b   : > { %s643_s13 = sshll.u32 %s964_s21, 2  ;;  %s45_s14 = ssub.s32 %s964_s21, %s1327_s9 }
  0x3c   : > { %s46_s30 = sor.u32 %s45_s14, %s44_s6  ;;  %s642_s7 = sshll.u32 %s204_s12, 5 }
  0x3d   : > { %p49_p13 = scmp.eq.s32.totalorder %s46_s30, 0  ;;  %s644_s26 = sshll.u32 %s960_s20, 3 }
  0x3e   : > { %s208_s23 = scalar_lea.vmem [#allocation2], %s642_s7  ;;  %s216_s8 = sadd.s32 %s644_s26, %s643_s13 }
  0x3f   : > { %s219_s24 = sshll.u32 %s208_s23, 4  ;;  %s645_s28 = sshll.u32 %s216_s8, 7  ;;  %s1130_s24 = int_to_ptr.vmem [resolvable:$true] %s219_s24 }
  0x40   : > { %s1128_s3 = scalar_select %p49_p13, %s948_s17, %s51_s10  }
  0x41   : > { %p1136_p0 = pnand %p711_p12, %p1115_p10  ;;  %s1143_s6 = scalar_lea.hbm %s1271_s0, %s645_s28 }
  0x42   : > { %s1145_s23 = scalar_lea.sflag [#allocation3], %s204_s12  ;;  %s836_s8 = scalar_lea.hbm %s1143_s6, 512 }
  0x43   : > { %p837_p3 = scmp.ne.s32.totalorder %s1143_s6, %s836_s8  ;;  %p838_p5 = pneg %p1136_p0 }
  0x44   : > { %s841_s9 = scalar_lea.hbm %s1271_s0, 2048  ;;  %p842_p1 = scmp.lt.u32.totalorder %s1143_s6, %s1271_s0 }
  0x45   : > { %p839_p7 = pnand %p838_p5, %p837_p3  ;;  %p843_p2 = scmp.lt.u32.totalorder %s841_s9, %s836_s8 }
  0x46   : > { %p845_p6 = scmp.lt.u32.totalorder %s836_s8, %s1143_s6 }
  0x47   : > { %p840_p9 = pneg %p839_p7  ;;  %p844_p4 = por %p843_p2, %p842_p1 }
  0x49   : > { %p846_p8 = por %p845_p6, %p844_p4 }
  0x4b   : > { %p847_p10 = pnand %p846_p8, %p840_p9 }
  0x4d   : > { %850 = shalt.err (!%p847_p10)
}
  0x4e   : > { %s851_s12 = scalar_lea.vmem %s1130_s24, 512  ;;  %s973_s13 = smov [#allocation2]  }
  0x4f   : > { %p852_p12 = scmp.ne.s32.totalorder %s1130_s24, %s851_s12  ;;  %s856_s14 = sshll.u32 %s973_s13, 4  ;;  %s857_s14 = int_to_ptr.vmem [resolvable:$false] %s856_s14 }
  0x50   : > { %s858_s30 = scalar_lea.vmem %s857_s14, 1024  ;;  %p859_p7 = scmp.lt.s32.totalorder %s1130_s24, %s857_s14 }
  0x51   : > { %p854_p13 = pnand %p852_p12, %p838_p5  ;;  %p860_p1 = scmp.lt.s32.totalorder %s858_s30, %s851_s12 }
  0x53   : > { %p855_p3 = pneg %p854_p13  ;;  %p861_p2 = por %p860_p1, %p859_p7 }
  0x55   : > { %p862_p4 = pnand %p861_p2, %p855_p3 }
  0x57   : > { %865 = shalt.err (!%p862_p4)
}
  0x58   : > { %s1304_s7 = smov 8   ;;  %s1305_s26 = smov 128  }
  0x59   : > { %705 = dma.hbm_to_vmem [thread:$0]  (!%p1136_p0), %s1143_s6, 512, %s1130_s24, %s1145_s23, %s1305_s26, %s1305_s26, %s1304_s7  }
  0x5a   : > { %p1306_p5 = scmp.ne.s32.totalorder %s1295_s29, 0 }
  0x5b   : > { %s1179_s8 = sand.u32 (!%p1306_p5), 1, %s944_s16   ;;  %p1307_p9 = scmp.ne.s32.totalorder (!%p1306_p5), %s1292_s27, 0 }
  0x5c   : > { %244 = sbr.rel (%p1306_p5) target bundleno = 369 (0x171), region = 36  ;;  %s647_s10 = sshll.u32 (!%p1306_p5), %s1179_s8, 5 }
  0x5d   : > { %s247_s4 = scalar_lea.sflag (!%p1306_p5), [#allocation3], %s1179_s8  ;;  %s1183_s9 = scalar_lea.vmem (!%p1306_p5), [#allocation2], %s647_s10 }
  0x63   : > { %927 = dma.done.wait (%p1307_p9), %s247_s4, 512  }
  0x64   : > { %929 = vsyncadd (%p1307_p9), %s247_s4, 4294966784  ;;  %p1308_p0 = scmp.ne.s32.totalorder %s1290_s25, 0 }
  0x66   : > { %931 = dma.done.wait (%p1308_p0), [#allocation6], 2048  }
  0x67   : > { %933 = vsyncadd (%p1308_p0), [#allocation6], 4294965248  ;;  %v974_v0 = vmov 0   ;;  %v784_v1 = vld [vmem:[#allocation5 + $0x4] ss:$8 sps:$4 sm:$0xff]   ;;  %p287_p6 = scmp.lt.s32.totalorder %s956_s19, 1  ;;  %v464_v28 = vlaneseq }
  0x68   : > { %441 = vmatprep.mubr.bf16.mxu0 %v974_v0  ;;  %451 = vmatprep.mubr.bf16.mxu1 %v974_v0  ;;  %v786_v2 = vld [vmem:[#allocation5] ss:$8 sps:$4 sm:$0xff]   ;;  %v787_v3 = vld [vmem:[#allocation5 + $0x14] ss:$8 sps:$4 sm:$0xff]   ;;  %v789_v4 = vld [vmem:[#allocation5 + $0x10] ss:$8 sps:$4 sm:$0xff]  }
  0x69   : > { %409 = vmatprep.subr.bf16.mxu0 %v784_v1  ;;  %674 = vmatprep.subr.bf16.mxu1 %v784_v1  ;;  %v790_v5 = vld [vmem:[#allocation5 + $0x24] ss:$8 sps:$4 sm:$0xff]   ;;  %v792_v6 = vld [vmem:[#allocation5 + $0x20] ss:$8 sps:$4 sm:$0xff]   ;;  %v793_v7 = vld [vmem:[#allocation5 + $0x34] ss:$8 sps:$4 sm:$0xff]  }
  0x6a   : > { %410 = vmatpush1.bf16.msra.mxu0 %v786_v2  ;;  %682 = vmatpush1.bf16.msra.mxu1 %v786_v2  ;;  %v795_v8 = vld [vmem:[#allocation5 + $0x30] ss:$8 sps:$4 sm:$0xff]   ;;  %v796_v9 = vld [vmem:[#allocation5 + $0x44] ss:$8 sps:$4 sm:$0xff]   ;;  %v798_v10 = vld [vmem:[#allocation5 + $0x40] ss:$8 sps:$4 sm:$0xff]  }
  0x6b   : > { %411 = vmatprep.subr.bf16.mxu0 %v787_v3  ;;  %675 = vmatprep.subr.bf16.mxu1 %v787_v3  ;;  %v799_v11 = vld [vmem:[#allocation5 + $0x54] ss:$8 sps:$4 sm:$0xff]   ;;  %s1195_s15 = scalar_select %p287_p6, %s956_s19, 1  ;;  %v801_v12 = vld [vmem:[#allocation5 + $0x50] ss:$8 sps:$4 sm:$0xff]   ;;  %v296_v15 = vld [vmem:[%s1183_s9] sm:$0xff] }
  0x6c   : > { %v802_v13 = vld [vmem:[#allocation5 + $0x64] ss:$8 sps:$4 sm:$0xff]   ;;  %v804_v14 = vld [vmem:[#allocation5 + $0x60] ss:$8 sps:$4 sm:$0xff]   ;;  %v298_v18 = vld [vmem:[%s1183_s9 + $0x10] sm:$0xff]  ;;  %v465_v29 = vshrl.u32 %v464_v28, 7 }
  0x6d   : > { %s289_s29 = scalar_lea.vmem %s1272_s1, %s1195_s15  ;;  %v297_v16 = vld [vmem:[%s1183_s9 + $0x8] sm:$0xff]  ;;  %v299_v19 = vld [vmem:[%s1183_s9 + $0x18] sm:$0xff]  ;;  %s650_s24 = sshll.u32 %s1195_s15, 1 }
  0x6e   : > { %412 = vmatpush1.bf16.msra.mxu0 %v789_v4  ;;  %683 = vmatpush1.bf16.msra.mxu1 %v789_v4  ;;  %v651_v17 = vld [vmem:[%s289_s29] ss:$0 sm:$0xff]  ;;  %v805_v20 = vld [vmem:[#allocation5 + $0x74] ss:$8 sps:$4 sm:$0xff]   ;;  %v807_v25 = vld [vmem:[#allocation5 + $0x70] ss:$8 sps:$4 sm:$0xff]   ;;  %s293_s28 = scalar_lea.vmem %s1273_s2, %s650_s24 }
  0x6f   : > { %413 = vmatprep.subr.bf16.mxu0 %v790_v5  ;;  %676 = vmatprep.subr.bf16.mxu1 %v790_v5  ;;  %v307_v21 = vmul.f32 %v651_v17, %v296_v15  ;;  %v308_v22 = vmul.f32 %v651_v17, %v297_v16  ;;  %v309_v23 = vmul.f32 %v651_v17, %v298_v18  ;;  %v466_v30 = vsub.s32 0, %v465_v29  ;;  %v462_v31 = vld [vmem:[%s293_s28] sm:$0x3]  ;;  %s669_s5 = sshll.u32 %s956_s19, 3  ;;  %s670_s12 = sshll.u32 %s952_s18, 4 }
  0x70   : > { %v310_v24 = vmul.f32 %v651_v17, %v299_v19  ;;  %v470_v32 = vsub.s32 1, %v465_v29  ;;  %s649_s13 = sshll.u32 %s1179_s8, 6  ;;  %s506_s14 = sadd.s32 %s670_s12, %s669_s5 }
  0x71   : > { %v311_v26 = vpack.c.bf16 %v308_v22, %v307_v21  ;;  %v467_v33 = vrot.slane %v462_v31, %v466_v30  ;;  %s285_s30 = scalar_lea.vmem [#allocation7], %s649_s13  ;;  %s671_s26 = sshll.u32 %s506_s14, 7 }
  0x72   : > { %414 = vmatpush1.bf16.msra.mxu0 %v792_v6  ;;  %684 = vmatpush1.bf16.msra.mxu1 %v792_v6  ;;  %v312_v27 = vpack.c.bf16 %v310_v24, %v309_v23  ;;  %v471_v34 = vrot.slane %v462_v31, %v470_v32  ;;  %s509_s7 = sshll.u32 %s285_s30, 4  ;;  %s1309_s10 = sld [smem:[#allocation16_spill]]  ;;  %s1212_s7 = int_to_ptr.vmem [resolvable:$true] %s509_s7 }
  0x73   : > { %415 = vmatprep.subr.bf16.mxu0 %v793_v7  ;;  %677 = vmatprep.subr.bf16.mxu1 %v793_v7  ;;  %s491_s9 = scalar_lea.sflag [#allocation4], %s1179_s8  ;;  %s866_s15 = scalar_lea.vmem %s1212_s7, 1024 }
  0x74   : > { %p867_p8 = scmp.ne.s32.totalorder %s1212_s7, %s866_s15  ;;  %s975_s25 = smov [#allocation7]  }
  0x75   : > { %s870_s27 = sshll.u32 %s975_s25, 4  ;;  %s871_s27 = int_to_ptr.vmem [resolvable:$false] %s870_s27 }
  0x76   : > { %416 = vmatpush1.bf16.msra.mxu0 %v795_v8  ;;  %685 = vmatpush1.bf16.msra.mxu1 %v795_v8  ;;  %p868_p10 = pnand %p867_p8, %p1111_p11  ;;  %s872_s29 = scalar_lea.vmem %s871_s27, 2048 }
  0x77   : > { %417 = vmatprep.subr.bf16.mxu0 %v796_v9  ;;  %678 = vmatprep.subr.bf16.mxu1 %v796_v9  ;;  %p873_p13 = scmp.lt.s32.totalorder %s1212_s7, %s871_s27  ;;  %p874_p3 = scmp.lt.s32.totalorder %s872_s29, %s866_s15 }
  0x78   : > { %s1217_s4 = scalar_lea.hbm %s1309_s10, %s671_s26  ;;  %p869_p12 = pneg %p868_p10 }
  0x79   : > { %p875_p7 = por %p874_p3, %p873_p13 }
  0x7a   : > { %418 = vmatpush1.bf16.msra.mxu0 %v798_v10  ;;  %686 = vmatpush1.bf16.msra.mxu1 %v798_v10 }
  0x7b   : > { %419 = vmatprep.subr.bf16.mxu0 %v799_v11  ;;  %679 = vmatprep.subr.bf16.mxu1 %v799_v11  ;;  %p876_p1 = pnand %p875_p7, %p869_p12 }
  0x7e   : > { %420 = vmatpush1.bf16.msra.mxu0 %v801_v12  ;;  %687 = vmatpush1.bf16.msra.mxu1 %v801_v12 }
  0x7f   : > { %421 = vmatprep.subr.bf16.mxu0 %v802_v13  ;;  %680 = vmatprep.subr.bf16.mxu1 %v802_v13 }
  0x82   : > { %422 = vmatpush1.bf16.msra.mxu0 %v804_v14  ;;  %688 = vmatpush1.bf16.msra.mxu1 %v804_v14 }
  0x83   : > { %423 = vmatprep.subr.bf16.mxu0 %v805_v20  ;;  %681 = vmatprep.subr.bf16.mxu1 %v805_v20 }
  0x86   : > { %424 = vmatpush1.bf16.msra.mxu0 %v807_v25  ;;  %689 = vmatpush1.bf16.msra.mxu1 %v807_v25 }
  0x89   : > { %442 = vmatmul.mubr.bf16.vlgmr.msra.gmra.mrb[0].mxu0 %v311_v26  ;;  %452 = vmatmul.mubr.bf16.vlgmr.msra.gmra.mrb[0].mxu1 %v312_v27 }
 0x15c   : > { %v443_v35 = vpop.f32.mrb[0].mxu0  ;;  %v453_v36 = vpop.f32.mrb[0].mxu1 }
 0x15d   : > { %v474_v37 = vmul.f32 %v467_v33, %v443_v35  ;;  %v478_v38 = vmul.f32 %v467_v33, %v453_v36  ;;  %v445_v39 = vpop.f32.mrb[1].mxu0  ;;  %v455_v40 = vpop.f32.mrb[1].mxu1 }
 0x15e   : > { %v475_v41 = vmul.f32 %v471_v34, %v445_v39  ;;  %v479_v42 = vmul.f32 %v471_v34, %v455_v40  ;;  %v447_v43 = vpop.f32.mrb[2].mxu0  ;;  %v457_v44 = vpop.f32.mrb[2].mxu1 }
 0x15f   : > { %482 = vst [vmem:[%s285_s30] sm:$0xff] %v474_v37  ;;  %486 = vst [vmem:[%s285_s30 + $0x20] sm:$0xff] %v478_v38  ;;  %v476_v45 = vmul.f32 %v467_v33, %v447_v43  ;;  %v480_v46 = vmul.f32 %v467_v33, %v457_v44  ;;  %v449_v47 = vpop.f32.mrb[3].mxu0  ;;  %v459_v48 = vpop.f32.mrb[3].mxu1 }
 0x160   : > { %483 = vst [vmem:[%s285_s30 + $0x8] sm:$0xff] %v475_v41  ;;  %487 = vst [vmem:[%s285_s30 + $0x28] sm:$0xff] %v479_v42  ;;  %v477_v49 = vmul.f32 %v471_v34, %v449_v47  ;;  %v481_v50 = vmul.f32 %v471_v34, %v459_v48 }
 0x161   : > { %484 = vst [vmem:[%s285_s30 + $0x10] sm:$0xff] %v476_v45  ;;  %488 = vst [vmem:[%s285_s30 + $0x30] sm:$0xff] %v480_v46 }
 0x162   : > { %485 = vst [vmem:[%s285_s30 + $0x18] sm:$0xff] %v477_v49  ;;  %489 = vst [vmem:[%s285_s30 + $0x38] sm:$0xff] %v481_v50 }
 0x163   : > { %879 = shalt.err (!%p876_p1)
}
 0x164   : > { %s880_s24 = scalar_lea.hbm %s1217_s4, 1024  ;;  %s884_s28 = scalar_lea.hbm %s1309_s10, 4096 }
 0x165   : > { %p881_p2 = scmp.ne.s32.totalorder %s1217_s4, %s880_s24  ;;  %p885_p9 = scmp.lt.u32.totalorder %s1217_s4, %s1309_s10 }
 0x166   : > { %p886_p0 = scmp.lt.u32.totalorder %s884_s28, %s880_s24  ;;  %p888_p8 = scmp.lt.u32.totalorder %s880_s24, %s1217_s4 }
 0x167   : > { %p882_p4 = pnand %p881_p2, %p1111_p11 }
 0x168   : > { %p887_p6 = por %p886_p0, %p885_p9 }
 0x169   : > { %p883_p5 = pneg %p882_p4 }
 0x16a   : > { %p889_p10 = por %p888_p8, %p887_p6 }
 0x16c   : > { %p890_p12 = pnand %p889_p10, %p883_p5 }
 0x16e   : > { %893 = shalt.err (!%p890_p12)
}
 0x16f   : > { %s976_s13 = smov 256   ;;  %s977_s14 = smov 16  }
 0x170   : > { %696 = dma.vmem_to_hbm [thread:$0]  (%p1111_p11), %s1212_s7, 1024, %s1217_s4, %s491_s9, %s976_s13, %s976_s13, %s977_s14  }
 0x171 PF: > { %s1310_s30 = sld [smem:[#allocation11_spill]]  ;;  %s1311_s26 = sld [smem:[#allocation12_spill]] }
 0x172   : > { %p713_p13 = scmp.ge.s32.totalorder %s968_s22, 2 }
 0x177   : > { %s524_s18 = sand.u32 1, %s1310_s30   ;;  %p1312_p3 = scmp.ne.s32.totalorder %s1311_s26, 0 }
 0x178   : > { %s525_s19 = scalar_lea.sflag [#allocation4], %s524_s18 }
 0x179   : > { %p707_p7 = pnand %p713_p13, %p1312_p3 }
 0x17b   : > { %935 = dma.done.wait (!%p707_p7), %s525_s19, 1024  }
 0x17c   : > { %937 = vsyncadd (!%p707_p7), %s525_s19, 4294966272  ;;  %s21_s22 = sadd.s32 1, %s968_s22   ;;  %s1313_s11 = sld [smem:[#allocation13_spill]] }
 0x17d   : > { %p18_p1 = scmp.ge.s32.totalorder %s21_s22, 6   ;;  %s1314_s8 = sld [smem:[#allocation14_spill]] }
 0x17e   : > { %s1315_s15 = smov %s944_s16  ;;  %s1316_s16 = smov %s948_s17 }
 0x17f   : > { %s1317_s17 = smov %s1128_s3  ;;  %s1318_s18 = smov %s960_s20 }
 0x180   : > { %s1319_s19 = smov %s964_s21  ;;  %20 = sbr.rel (!%p18_p1) target bundleno = 11 (0xb), region = 91 }
 0x182   : > { %s1320_s20 = smov %s1313_s11 }
 0x183   : > { %s1321_s21 = smov %s1314_s8 }
 0x187   :  { %530 = vsyncpa [#allocation3], 1 }
 0x188   :  { %532 = vsyncpa [#allocation3 + $0x1], 1 }
 0x189   :  { %533 = vsyncpa [#allocation6], 1 }
 0x18a   :  { %534 = vsyncpa [#allocation4], 1 }
 0x18b   :  { %536 = vsyncpa [#allocation4 + $0x1], 1 }

</bundles_post_ra>
